<compile_context>
chip_gen: v7x
topology: tpu7x:2x2x1
jax: 0.10.0
libtpu: 0.0.40
codegen_flags: <defaults>
</compile_context>

<pallas_src>
import functools

import jax
import jax.numpy as jnp
from jax.experimental import pallas as pl
from jax.experimental.pallas import tpu as pltpu


LANE_C_PAD = 8                              # num_classes (7) padded to 8 output columns
VMEM_BUDGET_BYTES = 12 * 1024 * 1024        # conservative vs. 16/32/32 MiB default scoped VMEM


def mlp_kernel(x_ref, w1_ref, b1_ref, w2_ref, b2_ref, o_ref):
    # x_ref:  (TB, D)  bf16 batch tile (pipelined over the batch grid axis)
    # w1_ref: (D, H)  f32,  b1_ref: (1, H) f32     -- VMEM-resident (constant index_map)
    # w2_ref: (H, 8)  f32,  b2_ref: (1, 8) f32     -- num_classes padded 7 -> 8 (zeros)
    # o_ref:  (TB, 8) f32
    # TODO(synk): nn.Dropout is identity in eval/inference mode; training-mode dropout
    # (random mask + 1/(1-p) scaling) is not implemented here.
    x = x_ref[...].astype(jnp.float32)
    h = jnp.dot(x, w1_ref[...], preferred_element_type=jnp.float32) + b1_ref[...]
    # Numerically stable sigmoid on the EUP slot: sigmoid(h) = 0.5 * (tanh(h/2) + 1).
    h = 0.5 * (jnp.tanh(0.5 * h) + 1.0)
    out = jnp.dot(h, w2_ref[...], preferred_element_type=jnp.float32) + b2_ref[...]
    o_ref[...] = out.astype(o_ref.dtype)


def _round_up(a: int, m: int) -> int:
    return ((a + m - 1) // m) * m


def _choose_tiling(b: int, d: int, h: int, tb_max: int):
    """Pick (TB, B_pad).

    TB is a multiple of 8, fits the VMEM budget (double-buffered bf16 x tile +
    double-buffered f32 out tile + double-buffered resident weights), keeps >= 2
    grid steps when the batch allows (so v7x's second TensorCore gets work), and
    preferably divides the sublane-rounded batch so no whole-tile padding copy of
    x is needed.  Falls back to padding up to one extra tile only if the batch's
    factorization would force pathologically small tiles.
    """
    b8 = _round_up(b, 8)
    bytes_per_row = 2 * (d * 2 + LANE_C_PAD * 4)                       # x (bf16) + out (f32), x2 buffers
    weight_bytes = 2 * (d * h + h + h * LANE_C_PAD + LANE_C_PAD) * 4   # resident weights, x2 buffers
    cap = (VMEM_BUDGET_BYTES - weight_bytes) // bytes_per_row
    cap = min(cap, tb_max, b8)
    if b8 >= 16:
        cap = min(cap, b8 // 2)          # keep >= 2 grid steps for v7x's two TensorCores
    cap = max(8, (cap // 8) * 8)

    tb = 8
    for cand in range(cap, 7, -8):       # largest multiple of 8 <= cap dividing b8
        if b8 % cand == 0:
            tb = cand
            break
    if tb * 4 < cap:                     # poor divisor -> accept padding one extra tile
        tb = cap
    return tb, _round_up(b8, tb)


def prepare_params(w1, b1, w2, b2):
    """One-time parameter prep (hoisted out of the per-call path):
    reshape fc1 bias to (1, H) and zero-pad fc2 from num_classes -> 8 columns."""
    d, h = w1.shape
    c = w2.shape[1]
    w2p = jnp.zeros((h, LANE_C_PAD), w2.dtype).at[:, :c].set(w2)
    b2p = jnp.zeros((1, LANE_C_PAD), b2.dtype).at[:, :c].set(b2.reshape(1, c))
    return (w1, b1.reshape(1, h), w2p, b2p)


@functools.partial(jax.jit, static_argnames=("num_classes", "tb_max"))
def mlp_forward(x, w1, b1_2d, w2p, b2p, *, num_classes: int = 7, tb_max: int = 4096):
    """x: (B, pad_len, input_size) -> (B, num_classes) float32 (eval-mode forward)."""
    B = x.shape[0]
    D, H = w1.shape

    # Flatten (free reshape) and cast to bf16: halves the dominant HBM read stream.
    x2d = x.reshape(B, D).astype(jnp.bfloat16)

    TB, B_pad = _choose_tiling(B, D, H, tb_max)
    if B_pad != B:
        # At most one tile (usually < 8 rows) of padding; padded rows are sliced off.
        x2d = jnp.pad(x2d, ((0, B_pad - B), (0, 0)))

    out = pl.pallas_call(
        mlp_kernel,
        out_shape=jax.ShapeDtypeStruct((B_pad, LANE_C_PAD), jnp.float32),
        grid=(B_pad // TB,),
        in_specs=[
            pl.BlockSpec((TB, D), lambda i: (i, 0)),             # x tile, pipelined
            pl.BlockSpec((D, H), lambda i: (0, 0)),              # w1, VMEM-resident
            pl.BlockSpec((1, H), lambda i: (0, 0)),              # b1, VMEM-resident
            pl.BlockSpec((H, LANE_C_PAD), lambda i: (0, 0)),     # w2 (padded), resident
            pl.BlockSpec((1, LANE_C_PAD), lambda i: (0, 0)),     # b2 (padded), resident
        ],
        out_specs=pl.BlockSpec((TB, LANE_C_PAD), lambda i: (i, 0)),
        compiler_params=pltpu.CompilerParams(
            dimension_semantics=("parallel",),   # shard batch steps across v7x's 2 TCs
        ),
    )(x2d, w1, b1_2d, w2p, b2p)

    return out[:B, :num_classes]


if __name__ == "__main__":
    # Small shapes consistent with the module:
    #   input_size (word-vector dim) = 16, pad_len = 8, hidden_size = 32,
    #   num_classes = 7, batch = 2.
    B, PAD_LEN, INPUT_SIZE = 2, 8, 16
    HIDDEN = 32
    NUM_CLASSES = 7
    D = INPUT_SIZE * PAD_LEN

    key = jax.random.PRNGKey(0)
    kx, kw1, kb1, kw2, kb2 = jax.random.split(key, 5)

    x = jax.random.normal(kx, (B, PAD_LEN, INPUT_SIZE), dtype=jnp.float32)

    # Deterministic init mimicking nn.Linear defaults: U(-1/sqrt(fan_in), +1/sqrt(fan_in))
    bound1 = 1.0 / (D ** 0.5)
    w1 = jax.random.uniform(kw1, (D, HIDDEN), jnp.float32, -bound1, bound1)
    b1 = jax.random.uniform(kb1, (HIDDEN,), jnp.float32, -bound1, bound1)
    bound2 = 1.0 / (HIDDEN ** 0.5)
    w2 = jax.random.uniform(kw2, (HIDDEN, NUM_CLASSES), jnp.float32, -bound2, bound2)
    b2 = jax.random.uniform(kb2, (NUM_CLASSES,), jnp.float32, -bound2, bound2)

    params = prepare_params(w1, b1, w2, b2)
    out = mlp_forward(x, *params, num_classes=NUM_CLASSES)
    out = jax.block_until_ready(out)

    # Pure-JAX reference of the same math (eval mode, x quantized to bf16 like the
    # kernel path).  Tolerance covers MXU pass-precision / tanh-vs-sigmoid ULP
    # differences; the bf16 input means exact f32 parity with torch is not claimed.
    x2d_ref = x.reshape(B, D).astype(jnp.bfloat16).astype(jnp.float32)
    ref = jax.nn.sigmoid(x2d_ref @ w1 + b1) @ w2 + b2
    assert out.shape == (B, NUM_CLASSES)
    max_err = float(jnp.max(jnp.abs(out - ref)))
    assert jnp.allclose(out, ref, atol=1e-2, rtol=1e-2), f"max abs err {max_err}"

    print("KERNEL_OK")
</pallas_src>

<mosaic_0001>
module attributes {stable_mosaic.version = 11 : i64} {
  func.func @mlp_kernel(%arg0: i32, %arg1: memref<8x128xbf16, #tpu.memory_space<vmem>>, %arg2: memref<128x32xf32, #tpu.memory_space<vmem>>, %arg3: memref<1x32xf32, #tpu.memory_space<vmem>>, %arg4: memref<32x8xf32, #tpu.memory_space<vmem>>, %arg5: memref<1x8xf32, #tpu.memory_space<vmem>>, %arg6: memref<8x8xf32, #tpu.memory_space<vmem>>) attributes {dimension_semantics = [#tpu.dimension_semantics<parallel>], iteration_bounds = array<i64: 1>, scalar_prefetch = 0 : i64, scratch_operands = 0 : i64, tpu.core_type = #tpu.core_type<tc>, window_params = [{transform_indices = @transform_0, window_bounds = array<i64: 8, 128>}, {pipeline_mode = #tpu.pipeline_mode<synchronous>, transform_indices = @transform_1, window_bounds = array<i64: 128, 32>}, {pipeline_mode = #tpu.pipeline_mode<synchronous>, transform_indices = @transform_2, window_bounds = array<i64: 1, 32>}, {pipeline_mode = #tpu.pipeline_mode<synchronous>, transform_indices = @transform_3, window_bounds = array<i64: 32, 8>}, {pipeline_mode = #tpu.pipeline_mode<synchronous>, transform_indices = @transform_4, window_bounds = array<i64: 1, 8>}, {transform_indices = @transform_5, window_bounds = array<i64: 8, 8>}]} {
    %c0 = arith.constant 0 : index
    %c0_0 = arith.constant 0 : index
    %0 = vector.load %arg1[%c0, %c0_0] : memref<8x128xbf16, #tpu.memory_space<vmem>>, vector<8x128xbf16>
    %1 = arith.extf %0 : vector<8x128xbf16> to vector<8x128xf32>
    %c0_1 = arith.constant 0 : index
    %c0_2 = arith.constant 0 : index
    %2 = vector.load %arg2[%c0_1, %c0_2] : memref<128x32xf32, #tpu.memory_space<vmem>>, vector<128x32xf32>
    %cst = arith.constant dense<0.000000e+00> : vector<8x32xf32>
    %3 = tpu.matmul %1, %2, %cst {dimension_numbers = #tpu.dot_dimension_numbers<[1], [0], [0], [1], [0, 0, 1, 1], [], []>} : vector<8x128xf32>, vector<128x32xf32>, vector<8x32xf32> -> vector<8x32xf32>
    %c0_3 = arith.constant 0 : index
    %c0_4 = arith.constant 0 : index
    %4 = vector.load %arg3[%c0_3, %c0_4] : memref<1x32xf32, #tpu.memory_space<vmem>>, vector<1x32xf32>
    %5 = vector.broadcast %4 : vector<1x32xf32> to vector<8x32xf32>
    %6 = arith.addf %3, %5 : vector<8x32xf32>
    %cst_5 = arith.constant 5.000000e-01 : f32
    %7 = vector.broadcast %cst_5 : f32 to vector<8x32xf32>
    %8 = arith.mulf %7, %6 : vector<8x32xf32>
    %9 = math.tanh %8 : vector<8x32xf32>
    %cst_6 = arith.constant 1.000000e+00 : f32
    %10 = vector.broadcast %cst_6 : f32 to vector<8x32xf32>
    %11 = arith.addf %9, %10 : vector<8x32xf32>
    %cst_7 = arith.constant 5.000000e-01 : f32
    %12 = vector.broadcast %cst_7 : f32 to vector<8x32xf32>
    %13 = arith.mulf %12, %11 : vector<8x32xf32>
    %c0_8 = arith.constant 0 : index
    %c0_9 = arith.constant 0 : index
    %14 = vector.load %arg4[%c0_8, %c0_9] : memref<32x8xf32, #tpu.memory_space<vmem>>, vector<32x8xf32>
    %cst_10 = arith.constant dense<0.000000e+00> : vector<8x8xf32>
    %15 = tpu.matmul %13, %14, %cst_10 {dimension_numbers = #tpu.dot_dimension_numbers<[1], [0], [0], [1], [0, 0, 1, 1], [], []>} : vector<8x32xf32>, vector<32x8xf32>, vector<8x8xf32> -> vector<8x8xf32>
    %c0_11 = arith.constant 0 : index
    %c0_12 = arith.constant 0 : index
    %16 = vector.load %arg5[%c0_11, %c0_12] : memref<1x8xf32, #tpu.memory_space<vmem>>, vector<1x8xf32>
    %17 = vector.broadcast %16 : vector<1x8xf32> to vector<8x8xf32>
    %18 = arith.addf %15, %17 : vector<8x8xf32>
    %c0_13 = arith.constant 0 : index
    %c0_14 = arith.constant 0 : index
    %19 = vector.load %arg6[%c0_13, %c0_14] : memref<8x8xf32, #tpu.memory_space<vmem>>, vector<8x8xf32>
    tpu.vector_store %arg6[%c0_13, %c0_14], %18 {strides = array<i32>} : memref<8x8xf32, #tpu.memory_space<vmem>>, vector<8x8xf32>,
    return
  }
  func.func @transform_0(%arg0: i32) -> (i32, i32) {
    %c0_i32 = arith.constant 0 : i32
    %c0_i32_0 = arith.constant 0 : i32
    return %arg0, %c0_i32 : i32, i32
  }
  func.func @transform_1(%arg0: i32) -> (i32, i32) {
    %c0_i32 = arith.constant 0 : i32
    %c0_i32_0 = arith.constant 0 : i32
    %c0_i32_1 = arith.constant 0 : i32
    return %c0_i32, %c0_i32_0 : i32, i32
  }
  func.func @transform_2(%arg0: i32) -> (i32, i32) {
    %c0_i32 = arith.constant 0 : i32
    %c0_i32_0 = arith.constant 0 : i32
    %c0_i32_1 = arith.constant 0 : i32
    return %c0_i32, %c0_i32_0 : i32, i32
  }
  func.func @transform_3(%arg0: i32) -> (i32, i32) {
    %c0_i32 = arith.constant 0 : i32
    %c0_i32_0 = arith.constant 0 : i32
    %c0_i32_1 = arith.constant 0 : i32
    return %c0_i32, %c0_i32_0 : i32, i32
  }
  func.func @transform_4(%arg0: i32) -> (i32, i32) {
    %c0_i32 = arith.constant 0 : i32
    %c0_i32_0 = arith.constant 0 : i32
    %c0_i32_1 = arith.constant 0 : i32
    return %c0_i32, %c0_i32_0 : i32, i32
  }
  func.func @transform_5(%arg0: i32) -> (i32, i32) {
    %c0_i32 = arith.constant 0 : i32
    %c0_i32_0 = arith.constant 0 : i32
    return %arg0, %c0_i32 : i32, i32
  }
}

</mosaic_0001>

<bundles_post_ra>
// kernel: mlp_forward.1
= control target key start
LH: loop header
LB: loop body
LE: loop exit
PB: predicated region body
PF: predicated region fallthrough
CT: control target
= control target key end

     0   :  { %v316_v0 = vmov 0.0|0.0   ;;  %vm317_vm0 = vmmov 0   ;;  %v318_v4 = vmov 0.0   ;;  %vm130_vm1 = vcmask 261120   ;;  %s421_s1 = inlined_call_operand.vmem [shape: f32[128,32], index: 1, kind: input, shape index: {}]   ;;  %s422_s0 = inlined_call_operand.vmem [shape: bf16[8,128], index: 0, kind: input, shape index: {}]   ;;  %s423_s3 = inlined_call_operand.vmem [shape: f32[32,8], index: 3, kind: input, shape index: {}]   ;;  %s424_s2 = inlined_call_operand.vmem [shape: f32[1,32], index: 2, kind: input, shape index: {}]   ;;  %s425_s4 = inlined_call_operand.vmem [shape: f32[1,8], index: 4, kind: input, shape index: {}]   ;;  %s426_s5 = inlined_call_operand.vmem [shape: f32[8,8], index: 5, kind: output, shape index: {}]  }
   0x1   :  { %281 = vmatprep.subr.bf16.mxu0 %v316_v0  ;;  %v22_v1 = vld [vmem:[%s421_s1] sm:$0xff]  ;;  %v23_v2 = vld [vmem:[%s421_s1 + $0x8] sm:$0xff]  ;;  %v24_v3 = vld [vmem:[%s421_s1 + $0x10] sm:$0xff]  ;;  %267 = vmatprep.mubr.msk.f32.mxu0 %vm317_vm0, %v318_v4  ;;  %vm204_vm2 = vcmask 64512  }
   0x2   :  { %v282_v5 = vpack.c.bf16 %v23_v2, %v22_v1  ;;  %v25_v6 = vld [vmem:[%s421_s1 + $0x18] sm:$0xff]  ;;  %305 = vmatprep.subr.bf16.mxu1 %v316_v0  ;;  %278 = vmatprep.mubr.msk.f32.mxu1 %vm317_vm0, %v318_v4  ;;  %v26_v8 = vld [vmem:[%s421_s1 + $0x20] sm:$0xff]  ;;  %v27_v9 = vld [vmem:[%s421_s1 + $0x28] sm:$0xff] }
   0x3   :  { %v285_v7 = vpack.c.bf16 %v25_v6, %v24_v3  ;;  %v288_v10 = vpack.c.bf16 %v27_v9, %v26_v8  ;;  %v28_v11 = vld [vmem:[%s421_s1 + $0x30] sm:$0xff]  ;;  %v29_v12 = vld [vmem:[%s421_s1 + $0x38] sm:$0xff]  ;;  %v30_v14 = vld [vmem:[%s421_s1 + $0x40] sm:$0xff] }
   0x4   :  { %283 = vmatpush3.bf16.msra.mxu0 %v282_v5  ;;  %v291_v13 = vpack.c.bf16 %v29_v12, %v28_v11  ;;  %v31_v15 = vld [vmem:[%s421_s1 + $0x48] sm:$0xff]  ;;  %v32_v17 = vld [vmem:[%s421_s1 + $0x50] sm:$0xff]  ;;  %v33_v18 = vld [vmem:[%s421_s1 + $0x58] sm:$0xff] }
   0x5   :  { %284 = vmatprep.subr.bf16.mxu0 %v316_v0  ;;  %v294_v16 = vpack.c.bf16 %v31_v15, %v30_v14  ;;  %v297_v19 = vpack.c.bf16 %v33_v18, %v32_v17  ;;  %v34_v20 = vld [vmem:[%s421_s1 + $0x60] sm:$0xff]  ;;  %v35_v21 = vld [vmem:[%s421_s1 + $0x68] sm:$0xff]  ;;  %v36_v23 = vld [vmem:[%s421_s1 + $0x70] sm:$0xff] }
   0x6   :  { %v300_v22 = vpack.c.bf16 %v35_v21, %v34_v20  ;;  %v37_v24 = vld [vmem:[%s421_s1 + $0x78] sm:$0xff]  ;;  %v20_v26 = vld [vmem:[%s422_s0] sm:$0xf]  ;;  %v120_v29 = vld [vmem:[%s423_s3 + $0x8] sm:$0xff] }
   0x7   :  { %v303_v25 = vpack.c.bf16 %v37_v24, %v36_v23  ;;  %v21_v27 = vunpack.c.l.bf16 %v20_v26  ;;  %v119_v28 = vld [vmem:[%s423_s3] sm:$0xff]  ;;  %v121_v31 = vld [vmem:[%s423_s3 + $0x10] sm:$0xff]  ;;  %v122_v32 = vld [vmem:[%s423_s3 + $0x18] sm:$0xff] }
   0x8   :  { %286 = vmatpush3.bf16.msra.mxu0 %v285_v7  ;;  %v306_v30 = vpack.c.bf16 %v120_v29, %v119_v28  ;;  %v309_v33 = vpack.c.bf16 %v122_v32, %v121_v31  ;;  %v210_v34 = vld [vmem:[%s424_s2] ss:$0 sm:$0xff] }
   0x9   :  { %287 = vmatprep.subr.bf16.mxu0 %v316_v0  ;;  %v211_v42 = vld [vmem:[%s425_s4] ss:$0 sm:$0xff] }
   0xa   :  { %307 = vmatpush3.bf16.msra.mxu1 %v306_v30 }
   0xb   :  { %308 = vmatprep.subr.bf16.mxu1 %v316_v0 }
   0xc   :  { %289 = vmatpush3.bf16.msra.mxu0 %v288_v10 }
   0xd   :  { %290 = vmatprep.subr.bf16.mxu0 %v316_v0 }
   0xe   :  { %310 = vmatpush3.bf16.msra.mxu1 %v309_v33 }
  0x10   :  { %292 = vmatpush3.bf16.msra.mxu0 %v291_v13 }
  0x11   :  { %293 = vmatprep.subr.bf16.mxu0 %v316_v0 }
  0x14   :  { %295 = vmatpush3.bf16.msra.mxu0 %v294_v16 }
  0x15   :  { %296 = vmatprep.subr.bf16.mxu0 %v316_v0 }
  0x18   :  { %298 = vmatpush3.bf16.msra.mxu0 %v297_v19 }
  0x19   :  { %299 = vmatprep.subr.bf16.mxu0 %v316_v0 }
  0x1c   :  { %301 = vmatpush3.bf16.msra.mxu0 %v300_v22 }
  0x1d   :  { %302 = vmatprep.subr.bf16.mxu0 %v316_v0 }
  0x20   :  { %304 = vmatpush3.bf16.msra.mxu0 %v303_v25 }
  0x23   :  { %268 = vmatmul.mubr.f32.vlgmr.msra.gmra.mrb[0].mxu0 %v21_v27 }
  0xf6   :  { %v111_v35 = vpop.f32.mrb[0].mxu0 }
  0xf7   :  { %v112_v36 = vadd.f32 %v210_v34, %v111_v35  ;;  %v269_v37 = vpop.f32.mrb[1].mxu0 }
  0xf9   :  { %v115_v38 = vmul.f32 0.5, %v112_v36 }
  0xfb   :  { %314 = vtanh.f32 %v115_v38 }
 0x105   :  { %v315_v39 = vpop.eup %314 }
 0x106   :  { %v117_v40 = vadd.f32 1.0, %v315_v39 }
 0x108   :  { %v118_v41 = vmul.f32 0.5, %v117_v40 }
 0x10a   :  { %279 = vmatmul.mubr.msk.f32.vlgmr.msra.gmra.mrb[0].mxu1 %vm130_vm1, %v118_v41 }
 0x1dd   :  { %v200_v43 = vpop.f32.mrb[0].mxu1 }
 0x1de   :  { %v201_v44 = vadd.f32 %v211_v42, %v200_v43  ;;  %v280_v45 = vpop.f32.mrb[1].mxu1 }
 0x1e0   :  { %205 = vst.msk [vmem:[%s426_s5] sm:$0xff] %vm204_vm2, %v201_v44 }

</bundles_post_ra>
